<compile_context>
chip_gen: v7x
topology: tpu7x:2x2x1
jax: 0.10.0
libtpu: 0.0.40
codegen_flags: <defaults>
</compile_context>

<pallas_src>
import jax
import jax.numpy as jnp
from jax.experimental import pallas as pl
from jax.experimental.pallas import tpu as pltpu

HIDDEN = 30    # fixed by the module definition (nn.Linear(s_dim, 30))
LANE = 128     # TPU lane width
SUBLANE = 8    # f32 sublane count


def _round_up(x, m):
    return (x + m - 1) // m * m


def anet_kernel(x_ref, w1_ref, w2_ref, o_ref):
    # layer 1: bias already folded in via the ones column of x / bias row of w1
    h = jnp.dot(x_ref[...], w1_ref[...], preferred_element_type=jnp.float32)
    h = jnp.maximum(h, 0.0)        # ReLU; passthrough column stays at relu(1)=1
    # layer 2: bias folded in via the passthrough column of h / bias row of w2
    y = jnp.dot(h, w2_ref[...], preferred_element_type=jnp.float32)
    o_ref[...] = jnp.tanh(y) * 2.0     # actions_value = 2 * tanh(out(x))


def anet_forward(x, w1, b1, w2, b2, *, block_b=1024):
    """x:(B,s_dim), w1:(s_dim,30), b1:(1,30)|(30,), w2:(30,a_dim), b2:(1,a_dim)|(a_dim,)"""
    B, s_dim = x.shape
    a_dim = w2.shape[1]

    S_pad = _round_up(s_dim + 1, LANE)    # input features + bias-ones column
    H_pad = _round_up(HIDDEN + 1, LANE)   # hidden units + bias-passthrough column
    A_pad = _round_up(a_dim, LANE)        # lane-dense output

    use_grid = B > block_b
    B_pad = _round_up(B, block_b if use_grid else SUBLANE)

    # ---- pack / pad (layout plumbing only; weights would be packed offline) ----
    xp = jnp.zeros((B_pad, S_pad), jnp.float32)
    xp = xp.at[:B, :s_dim].set(x.astype(jnp.float32))
    xp = xp.at[:B, s_dim].set(1.0)                                # ones column

    w1p = jnp.zeros((S_pad, H_pad), jnp.float32)
    w1p = w1p.at[:s_dim, :HIDDEN].set(w1.astype(jnp.float32))
    w1p = w1p.at[s_dim, :HIDDEN].set(jnp.reshape(b1, (-1,)))      # fc1 bias row
    w1p = w1p.at[s_dim, HIDDEN].set(1.0)                          # h[:,HIDDEN]==1

    w2p = jnp.zeros((H_pad, A_pad), jnp.float32)
    w2p = w2p.at[:HIDDEN, :a_dim].set(w2.astype(jnp.float32))
    w2p = w2p.at[HIDDEN, :a_dim].set(jnp.reshape(b2, (-1,)))      # out bias row

    out_shape = jax.ShapeDtypeStruct((B_pad, A_pad), jnp.float32)

    if not use_grid:
        # Everything fits in one VMEM block: grid-free call, no pipeline overhead.
        vmem = pl.BlockSpec(memory_space=pltpu.MemorySpace.VMEM)
        out = pl.pallas_call(
            anet_kernel,
            out_shape=out_shape,
            in_specs=[vmem, vmem, vmem],
            out_specs=vmem,
        )(xp, w1p, w2p)
    else:
        # Large batch: tile over B; weights stay resident (constant index_map);
        # "parallel" lets megacore (v7x) split the batch across TensorCores.
        nb = B_pad // block_b
        out = pl.pallas_call(
            anet_kernel,
            out_shape=out_shape,
            grid=(nb,),
            in_specs=[
                pl.BlockSpec((block_b, S_pad), lambda i: (i, 0)),
                pl.BlockSpec((S_pad, H_pad), lambda i: (0, 0)),
                pl.BlockSpec((H_pad, A_pad), lambda i: (0, 0)),
            ],
            out_specs=pl.BlockSpec((block_b, A_pad), lambda i: (i, 0)),
            compiler_params=pltpu.CompilerParams(
                dimension_semantics=("parallel",)),
        )(xp, w1p, w2p)

    return out[:B, :a_dim]


def anet_reference(x, w1, b1, w2, b2):
    h = jnp.maximum(x @ w1 + jnp.reshape(b1, (1, -1)), 0.0)
    return jnp.tanh(h @ w2 + jnp.reshape(b2, (1, -1))) * 2.0


if __name__ == "__main__":
    # Small, deterministic synthetic setup (no checkpoint loading).
    B, s_dim, a_dim = 2, 8, 4

    key = jax.random.PRNGKey(0)
    k_x, k_w1, k_b1, k_w2, k_b2 = jax.random.split(key, 5)

    x = jax.random.normal(k_x, (B, s_dim), dtype=jnp.float32)

    # fc1.weight.data.normal_(0, 0.1) -> stored transposed as (s_dim, 30)
    w1 = 0.1 * jax.random.normal(k_w1, (s_dim, HIDDEN), dtype=jnp.float32)
    # PyTorch Linear bias default init: U(-1/sqrt(fan_in), 1/sqrt(fan_in))
    b1 = jax.random.uniform(k_b1, (1, HIDDEN), dtype=jnp.float32,
                            minval=-1.0 / jnp.sqrt(s_dim),
                            maxval=1.0 / jnp.sqrt(s_dim))

    # out.weight.data.normal_(0, 0.1) -> stored transposed as (30, a_dim)
    w2 = 0.1 * jax.random.normal(k_w2, (HIDDEN, a_dim), dtype=jnp.float32)
    b2 = jax.random.uniform(k_b2, (1, a_dim), dtype=jnp.float32,
                            minval=-1.0 / jnp.sqrt(HIDDEN),
                            maxval=1.0 / jnp.sqrt(HIDDEN))

    out = anet_forward(x, w1, b1, w2, b2)
    out = jax.block_until_ready(out)

    ref = anet_reference(x, w1, b1, w2, b2)
    assert out.shape == (B, a_dim)
    assert jnp.allclose(out, ref, atol=1e-5, rtol=1e-5), "mismatch vs reference"

    print("KERNEL_OK")
</pallas_src>

<mosaic_0001>
module attributes {stable_mosaic.version = 11 : i64} {
  func.func @anet_kernel(%arg0: memref<8x128xf32, #tpu.memory_space<vmem>>, %arg1: memref<128x128xf32, #tpu.memory_space<vmem>>, %arg2: memref<128x128xf32, #tpu.memory_space<vmem>>, %arg3: memref<8x128xf32, #tpu.memory_space<vmem>>) attributes {dimension_semantics = [], scalar_prefetch = 0 : i64, scratch_operands = 0 : i64, tpu.core_type = #tpu.core_type<tc>} {
    %c0 = arith.constant 0 : index
    %c0_0 = arith.constant 0 : index
    %0 = vector.load %arg0[%c0, %c0_0] : memref<8x128xf32, #tpu.memory_space<vmem>>, vector<8x128xf32>
    %c0_1 = arith.constant 0 : index
    %c0_2 = arith.constant 0 : index
    %1 = vector.load %arg1[%c0_1, %c0_2] : memref<128x128xf32, #tpu.memory_space<vmem>>, vector<128x128xf32>
    %cst = arith.constant dense<0.000000e+00> : vector<8x128xf32>
    %2 = tpu.matmul %0, %1, %cst {dimension_numbers = #tpu.dot_dimension_numbers<[1], [0], [0], [1], [0, 0, 1, 1], [], []>} : vector<8x128xf32>, vector<128x128xf32>, vector<8x128xf32> -> vector<8x128xf32>
    %cst_3 = arith.constant 0.000000e+00 : f32
    %3 = vector.broadcast %cst_3 : f32 to vector<8x128xf32>
    %4 = arith.maximumf %2, %3 : vector<8x128xf32>
    %c0_4 = arith.constant 0 : index
    %c0_5 = arith.constant 0 : index
    %5 = vector.load %arg2[%c0_4, %c0_5] : memref<128x128xf32, #tpu.memory_space<vmem>>, vector<128x128xf32>
    %cst_6 = arith.constant dense<0.000000e+00> : vector<8x128xf32>
    %6 = tpu.matmul %4, %5, %cst_6 {dimension_numbers = #tpu.dot_dimension_numbers<[1], [0], [0], [1], [0, 0, 1, 1], [], []>} : vector<8x128xf32>, vector<128x128xf32>, vector<8x128xf32> -> vector<8x128xf32>
    %7 = math.tanh %6 : vector<8x128xf32>
    %cst_7 = arith.constant 2.000000e+00 : f32
    %8 = vector.broadcast %cst_7 : f32 to vector<8x128xf32>
    %9 = arith.mulf %7, %8 : vector<8x128xf32>
    %c0_8 = arith.constant 0 : index
    %c0_9 = arith.constant 0 : index
    %10 = vector.load %arg3[%c0_8, %c0_9] : memref<8x128xf32, #tpu.memory_space<vmem>>, vector<8x128xf32>
    tpu.vector_store %arg3[%c0_8, %c0_9], %9 {strides = array<i32>} : memref<8x128xf32, #tpu.memory_space<vmem>>, vector<8x128xf32>,
    return
  }
}

</mosaic_0001>

<bundles_post_ra>
// kernel: tpu_custom_call.1
= control target key start
LH: loop header
LB: loop body
LE: loop exit
PB: predicated region body
PF: predicated region fallthrough
CT: control target
= control target key end

     0   :  { %8 = vsyncpa [#allocation3], 0  ;;  %s603_s0 = inlined_call_operand.hbm [shape: f32[8,128], index: 0, kind: input, shape index: {}]   ;;  %s604_s1 = inlined_call_operand.hbm [shape: f32[128,128], index: 1, kind: input, shape index: {}]   ;;  %s605_s2 = inlined_call_operand.hbm [shape: f32[128,128], index: 2, kind: input, shape index: {}]   ;;  %s606_s3 = inlined_call_operand.hbm [shape: f32[8,128], index: 3, kind: output, shape index: {}]  }
   0x1   :  { %9 = vsyncpa [#allocation6], 0 }
   0x2   :  { %10 = vsyncpa [#allocation4], 0  ;;  %s504_s12 = smov [#allocation5]   ;;  %s410_s16 = scalar_lea.hbm %s604_s1, 2048 }
   0x3   :  { %s26_s13 = sshll.u32 %s504_s12, 4  ;;  %p411_p0 = scmp.ne.s32.totalorder %s604_s1, %s410_s16  ;;  %s27_s13 = int_to_ptr.vmem [resolvable:$true] %s26_s13 }
   0x4   :  { %p414_p1 = scmp.lt.u32.totalorder %s410_s16, %s604_s1 }
   0x6   :  { %p416_p2 = pnand %p414_p1, %p411_p0 }
   0x8   :  { %419 = shalt.err (!%p416_p2)
}
   0x9   :  { %s420_s21 = scalar_lea.vmem %s27_s13, 2048  ;;  %p425_p4 = scmp.lt.s32.totalorder %s27_s13, %s27_s13 }
   0xa   :  { %p421_p3 = scmp.ne.s32.totalorder %s27_s13, %s420_s21  ;;  %p426_p5 = scmp.lt.s32.totalorder %s420_s21, %s420_s21 }
   0xc   :  { %p427_p6 = por %p426_p5, %p425_p4 }
   0xe   :  { %p428_p7 = pnand %p427_p6, %p421_p3 }
  0x10   :  { %431 = shalt.err (!%p428_p7)
}
  0x11   :  { %s505_s22 = smov 128   ;;  %s506_s23 = smov 8  }
  0x12   :  { %32 = dma.hbm_to_vmem [thread:$0]  %s604_s1, 2048, %s27_s13, [#allocation6], %s505_s22, %s505_s22, %s506_s23  }
  0x13   :  { %s507_s26 = smov [#allocation2]   ;;  %s508_s28 = smov [#allocation7]  }
  0x14   :  { %s17_s27 = sshll.u32 %s507_s26, 4  ;;  %s38_s29 = sshll.u32 %s508_s28, 4  ;;  %s18_s27 = int_to_ptr.vmem [resolvable:$true] %s17_s27  ;;  %s39_s29 = int_to_ptr.vmem [resolvable:$true] %s38_s29 }
  0x15   :  { %s432_s5 = scalar_lea.hbm %s603_s0, 128 }
  0x16   :  { %p433_p8 = scmp.ne.s32.totalorder %s603_s0, %s432_s5  ;;  %p436_p9 = scmp.lt.u32.totalorder %s432_s5, %s603_s0 }
  0x18   :  { %p438_p10 = pnand %p436_p9, %p433_p8 }
  0x1a   :  { %441 = shalt.err (!%p438_p10)
}
  0x1b   :  { %s442_s1 = scalar_lea.vmem %s18_s27, 128  ;;  %p447_p12 = scmp.lt.s32.totalorder %s18_s27, %s18_s27 }
  0x1c   :  { %p443_p11 = scmp.ne.s32.totalorder %s18_s27, %s442_s1  ;;  %p448_p13 = scmp.lt.s32.totalorder %s442_s1, %s442_s1 }
  0x1e   :  { %p449_p0 = por %p448_p13, %p447_p12 }
  0x20   :  { %p450_p1 = pnand %p449_p0, %p443_p11 }
  0x22   :  { %453 = shalt.err (!%p450_p1)
}
  0x23   :  { %20 = dma.hbm_to_vmem [thread:$0]  %s603_s0, 128, %s18_s27, [#allocation3]  }
  0x24   :  { %s454_s14 = scalar_lea.hbm %s605_s2, 2048 }
  0x25   :  { %p455_p2 = scmp.ne.s32.totalorder %s605_s2, %s454_s14  ;;  %p458_p3 = scmp.lt.u32.totalorder %s454_s14, %s605_s2 }
  0x27   :  { %p460_p4 = pnand %p458_p3, %p455_p2 }
  0x29   :  { %463 = shalt.err (!%p460_p4)
}
  0x2a   :  { %s464_s19 = scalar_lea.vmem %s39_s29, 2048  ;;  %p469_p6 = scmp.lt.s32.totalorder %s39_s29, %s39_s29 }
  0x2b   :  { %p465_p5 = scmp.ne.s32.totalorder %s39_s29, %s464_s19  ;;  %p470_p7 = scmp.lt.s32.totalorder %s464_s19, %s464_s19 }
  0x2d   :  { %p471_p8 = por %p470_p7, %p469_p6 }
  0x2f   :  { %p472_p9 = pnand %p471_p8, %p465_p5 }
  0x31   :  { %475 = shalt.err (!%p472_p9)
}
  0x32   :  { %44 = dma.hbm_to_vmem [thread:$0]  %s605_s2, 2048, %s39_s29, [#allocation6], %s505_s22, %s505_s22, %s506_s23  }
  0x33   :  { %498 = dma.done.wait [#allocation3], 128  }
  0x34   :  { %499 = vsyncadd [#allocation3], 4294967168 }
  0x35   :  { %500 = dma.done.wait [#allocation6], 4096  }
  0x36   :  { %501 = vsyncadd [#allocation6], 4294963200  ;;  %v509_v0 = vmov 0.0|0.0   ;;  %vm510_vm0 = vmmov 0   ;;  %v511_v1 = vmov 0.0   ;;  %v55_v2 = vld [vmem:[#allocation5] sm:$0xff] }
  0x37   :  { %351 = vmatprep.subr.bf16.mxu0 %v509_v0  ;;  %313 = vmatprep.mubr.msk.f32.mxu0 %vm510_vm0, %v511_v1  ;;  %v56_v3 = vld [vmem:[#allocation5 + $0x8] sm:$0xff]  ;;  %v57_v4 = vld [vmem:[#allocation5 + $0x10] sm:$0xff]  ;;  %v58_v6 = vld [vmem:[#allocation5 + $0x18] sm:$0xff]  ;;  %s512_s2 = smov [#allocation8]  }
  0x38   :  { %375 = vmatprep.subr.bf16.mxu1 %v509_v0  ;;  %348 = vmatprep.mubr.msk.f32.mxu1 %vm510_vm0, %v511_v1  ;;  %v352_v5 = vpack.c.bf16 %v56_v3, %v55_v2  ;;  %v355_v7 = vpack.c.bf16 %v58_v6, %v57_v4  ;;  %v59_v8 = vld [vmem:[#allocation5 + $0x20] sm:$0xff]  ;;  %v60_v9 = vld [vmem:[#allocation5 + $0x28] sm:$0xff]  ;;  %v144_v12 = vld [vmem:[#allocation7 + $0x10] sm:$0xff]  ;;  %s237_s21 = sshll.u32 %s512_s2, 4  ;;  %s238_s21 = int_to_ptr.vmem [resolvable:$true] %s237_s21 }
  0x39   :  { %v142_v10 = vld [vmem:[#allocation7] sm:$0xff]  ;;  %v143_v11 = vld [vmem:[#allocation7 + $0x8] sm:$0xff]  ;;  %v145_v13 = vld [vmem:[#allocation7 + $0x18] sm:$0xff]  ;;  %v358_v14 = vpack.c.bf16 %v60_v9, %v59_v8  ;;  %s476_s22 = scalar_lea.vmem %s238_s21, 128  ;;  %p481_p11 = scmp.lt.s32.totalorder %s238_s21, %s238_s21 }
  0x3a   :  { %353 = vmatpush3.bf16.msra.mxu0 %v352_v5  ;;  %v376_v15 = vpack.c.bf16 %v143_v11, %v142_v10  ;;  %v61_v16 = vld [vmem:[#allocation5 + $0x30] sm:$0xff]  ;;  %v62_v17 = vld [vmem:[#allocation5 + $0x38] sm:$0xff]  ;;  %v379_v18 = vpack.c.bf16 %v145_v13, %v144_v12  ;;  %v146_v19 = vld [vmem:[#allocation7 + $0x20] sm:$0xff]  ;;  %p477_p10 = scmp.ne.s32.totalorder %s238_s21, %s476_s22  ;;  %p482_p12 = scmp.lt.s32.totalorder %s476_s22, %s476_s22 }
  0x3b   :  { %354 = vmatprep.subr.bf16.mxu0 %v509_v0  ;;  %v147_v20 = vld [vmem:[#allocation7 + $0x28] sm:$0xff]  ;;  %v361_v21 = vpack.c.bf16 %v62_v17, %v61_v16  ;;  %v63_v22 = vld [vmem:[#allocation5 + $0x40] sm:$0xff]  ;;  %v148_v25 = vld [vmem:[#allocation7 + $0x30] sm:$0xff] }
  0x3c   :  { %377 = vmatpush3.bf16.msra.mxu1 %v376_v15  ;;  %v64_v23 = vld [vmem:[#allocation5 + $0x48] sm:$0xff]  ;;  %v382_v24 = vpack.c.bf16 %v147_v20, %v146_v19  ;;  %v149_v26 = vld [vmem:[#allocation7 + $0x38] sm:$0xff]  ;;  %v65_v28 = vld [vmem:[#allocation5 + $0x50] sm:$0xff]  ;;  %p483_p13 = por %p482_p12, %p481_p11 }
  0x3d   :  { %378 = vmatprep.subr.bf16.mxu1 %v509_v0  ;;  %v364_v27 = vpack.c.bf16 %v64_v23, %v63_v22  ;;  %v66_v29 = vld [vmem:[#allocation5 + $0x58] sm:$0xff]  ;;  %v385_v30 = vpack.c.bf16 %v149_v26, %v148_v25  ;;  %v150_v31 = vld [vmem:[#allocation7 + $0x40] sm:$0xff]  ;;  %v151_v32 = vld [vmem:[#allocation7 + $0x48] sm:$0xff] }
  0x3e   :  { %356 = vmatpush3.bf16.msra.mxu0 %v355_v7  ;;  %v367_v33 = vpack.c.bf16 %v66_v29, %v65_v28  ;;  %v67_v34 = vld [vmem:[#allocation5 + $0x60] sm:$0xff]  ;;  %v68_v35 = vld [vmem:[#allocation5 + $0x68] sm:$0xff]  ;;  %v388_v36 = vpack.c.bf16 %v151_v32, %v150_v31  ;;  %v152_v37 = vld [vmem:[#allocation7 + $0x50] sm:$0xff]  ;;  %p484_p0 = pnand %p483_p13, %p477_p10 }
  0x3f   :  { %357 = vmatprep.subr.bf16.mxu0 %v509_v0  ;;  %v153_v38 = vld [vmem:[#allocation7 + $0x58] sm:$0xff]  ;;  %v370_v39 = vpack.c.bf16 %v68_v35, %v67_v34  ;;  %v69_v40 = vld [vmem:[#allocation5 + $0x70] sm:$0xff]  ;;  %v154_v43 = vld [vmem:[#allocation7 + $0x60] sm:$0xff] }
  0x40   :  { %380 = vmatpush3.bf16.msra.mxu1 %v379_v18  ;;  %v70_v41 = vld [vmem:[#allocation5 + $0x78] sm:$0xff]  ;;  %v391_v42 = vpack.c.bf16 %v153_v38, %v152_v37  ;;  %v155_v44 = vld [vmem:[#allocation7 + $0x68] sm:$0xff]  ;;  %v156_v48 = vld [vmem:[#allocation7 + $0x70] sm:$0xff] }
  0x41   :  { %381 = vmatprep.subr.bf16.mxu1 %v509_v0  ;;  %v373_v45 = vpack.c.bf16 %v70_v41, %v69_v40  ;;  %v394_v46 = vpack.c.bf16 %v155_v44, %v154_v43  ;;  %v54_v47 = vld [vmem:[#allocation2] sm:$0xff] }
  0x42   :  { %359 = vmatpush3.bf16.msra.mxu0 %v358_v14  ;;  %v157_v49 = vld [vmem:[#allocation7 + $0x78] sm:$0xff] }
  0x43   :  { %360 = vmatprep.subr.bf16.mxu0 %v509_v0  ;;  %v397_v50 = vpack.c.bf16 %v157_v49, %v156_v48 }
  0x44   :  { %383 = vmatpush3.bf16.msra.mxu1 %v382_v24 }
  0x45   :  { %384 = vmatprep.subr.bf16.mxu1 %v509_v0 }
  0x46   :  { %362 = vmatpush3.bf16.msra.mxu0 %v361_v21 }
  0x47   :  { %363 = vmatprep.subr.bf16.mxu0 %v509_v0 }
  0x48   :  { %386 = vmatpush3.bf16.msra.mxu1 %v385_v30 }
  0x49   :  { %387 = vmatprep.subr.bf16.mxu1 %v509_v0 }
  0x4a   :  { %365 = vmatpush3.bf16.msra.mxu0 %v364_v27 }
  0x4b   :  { %366 = vmatprep.subr.bf16.mxu0 %v509_v0 }
  0x4c   :  { %389 = vmatpush3.bf16.msra.mxu1 %v388_v36 }
  0x4d   :  { %390 = vmatprep.subr.bf16.mxu1 %v509_v0 }
  0x4e   :  { %368 = vmatpush3.bf16.msra.mxu0 %v367_v33 }
  0x4f   :  { %369 = vmatprep.subr.bf16.mxu0 %v509_v0 }
  0x50   :  { %392 = vmatpush3.bf16.msra.mxu1 %v391_v42 }
  0x51   :  { %393 = vmatprep.subr.bf16.mxu1 %v509_v0 }
  0x52   :  { %371 = vmatpush3.bf16.msra.mxu0 %v370_v39 }
  0x53   :  { %372 = vmatprep.subr.bf16.mxu0 %v509_v0 }
  0x54   :  { %395 = vmatpush3.bf16.msra.mxu1 %v394_v46 }
  0x55   :  { %396 = vmatprep.subr.bf16.mxu1 %v509_v0 }
  0x56   :  { %374 = vmatpush3.bf16.msra.mxu0 %v373_v45 }
  0x58   :  { %398 = vmatpush3.bf16.msra.mxu1 %v397_v50 }
  0x59   :  { %314 = vmatmul.mubr.f32.vlgmr.msra.gmra.mrb[0].mxu0 %v54_v47 }
 0x12c   :  { %v137_v51 = vpop.f32.mrb[0].mxu0 }
 0x12d   :  { %v141_v52 = vmax.f32 %v137_v51, 0.0  ;;  %v315_v53 = vpop.f32.mrb[1].mxu0 }
 0x12f   :  { %349 = vmatmul.mubr.f32.vlgmr.msra.gmra.mrb[0].mxu1 %v141_v52 }
 0x202   :  { %v224_v54 = vpop.f32.mrb[0].mxu1 }
 0x203   :  { %408 = vtanh.f32 %v224_v54  ;;  %v350_v55 = vpop.f32.mrb[1].mxu1 }
 0x20d   :  { %v409_v56 = vpop.eup %408 }
 0x20e   :  { %v229_v57 = vmul.f32 2.0, %v409_v56 }
 0x210   :  { %230 = vst [vmem:[#allocation8] sm:$0xff] %v229_v57 }
 0x211   :  { %487 = shalt.err (!%p484_p0)
}
 0x212   :  { %s488_s25 = scalar_lea.hbm %s606_s3, 128 }
 0x213   :  { %p489_p1 = scmp.ne.s32.totalorder %s606_s3, %s488_s25  ;;  %p492_p2 = scmp.lt.u32.totalorder %s488_s25, %s606_s3 }
 0x215   :  { %p494_p3 = pnand %p492_p2, %p489_p1 }
 0x217   :  { %497 = shalt.err (!%p494_p3)
}
 0x218   :  { %240 = dma.vmem_to_hbm [thread:$0]  %s238_s21, 128, %s606_s3, [#allocation4]  }
 0x219   :  { %502 = dma.done.wait [#allocation4], 128  }
 0x21a   :  { %503 = vsyncadd [#allocation4], 4294967168 }
 0x21b   :  { %244 = vsyncpa [#allocation3], 1 }
 0x21c   :  { %245 = vsyncpa [#allocation6], 1 }
 0x21d   :  { %246 = vsyncpa [#allocation4], 1 }

</bundles_post_ra>
